<compile_context>
chip_gen: v6e
topology: v6e:2x2x1
jax: 0.10.0
libtpu: 0.0.40
codegen_flags: <defaults>
</compile_context>

<pallas_src>
import jax
import jax.numpy as jnp
from jax.experimental import pallas as pl
from jax.experimental.pallas import tpu as pltpu


LANES = 128
SUBLANES = 8
_MIN_PALLAS_ELEMENTS = 64 * 1024  # below this, XLA-fused jnp path wins


def _round_up(x, m):
    return ((x + m - 1) // m) * m


_TPU_VMEM_CAP = None


def _tpu_vmem_capacity_bytes():
    """Per-TensorCore VMEM capacity; conservative fallback if query fails."""
    global _TPU_VMEM_CAP
    if _TPU_VMEM_CAP is None:
        cap = 64 * 1024 * 1024  # conservative: v7x per-TC VMEM
        try:
            info = pltpu.get_tpu_info()
            c = getattr(info, "vmem_capacity_bytes", None)
            if c:
                cap = int(c)
        except Exception:
            pass
        _TPU_VMEM_CAP = cap
    return _TPU_VMEM_CAP


def _scale_exp_kernel(scale_ref, x_ref, o_ref):
    # scale_ref: SMEM (1,) scalar-prefetch ref; x_ref / o_ref: VMEM tiles.
    s = scale_ref[0]
    x = x_ref[...].astype(jnp.float32)  # widen in-kernel (VPU, hidden under DMA)
    o_ref[...] = jnp.exp(x * s).astype(o_ref.dtype)


def scale_exp(x, scale, *, min_pallas_elements=_MIN_PALLAS_ELEMENTS):
    """exp(x * scale) for an arbitrary-shape array (elementwise)."""
    orig_shape = x.shape
    orig_dtype = x.dtype

    # dtype policy: bf16/f32 run natively; f16/f64/int are computed in f32.
    if orig_dtype == jnp.float32 or orig_dtype == jnp.bfloat16:
        kdtype = orig_dtype
        out_dtype = orig_dtype
    else:
        kdtype = jnp.float32
        out_dtype = jnp.float64 if orig_dtype == jnp.float64 else jnp.float32
        x = x.astype(jnp.float32)

    s_f32 = jnp.asarray(scale, dtype=jnp.float32).reshape(())
    n = x.size

    # Small-input fast path: let XLA fuse mul+exp; avoids pallas_call overhead.
    # (Also guarantees the kernel path always sees >= 8 full 128-lane rows.)
    if n < max(int(min_pallas_elements), SUBLANES * LANES):
        out = jnp.exp(x.astype(jnp.float32) * s_f32).astype(out_dtype)
        return out.reshape(orig_shape)

    flat = x.reshape(-1)
    n_main = (n // LANES) * LANES            # 128-aligned prefix for the kernel
    rows = n_main // LANES
    x2d = (flat if n_main == n else flat[:n_main]).reshape(rows, LANES)

    # Generation-aware block sizing.
    vmem_cap = _tpu_vmem_capacity_bytes()
    if vmem_cap >= 96 * 1024 * 1024:          # v5e / v6e (128 MiB physical VMEM)
        target_rows = 16384                   # 8 MiB per f32 block
        vmem_limit = 64 * 1024 * 1024
    else:                                     # v7x (64 MiB per TensorCore)
        target_rows = 8192                    # 4 MiB per f32 block
        vmem_limit = 32 * 1024 * 1024

    # Clamp so the grid has >= 2 steps whenever possible (megacore / v7x).
    half_rows = _round_up(pl.cdiv(rows, 2), SUBLANES)
    block_rows = max(SUBLANES, min(target_rows, half_rows))
    grid = (pl.cdiv(rows, block_rows),)       # boundary block masked by Pallas

    itemsize = jnp.dtype(kdtype).itemsize
    cost = pl.CostEstimate(
        flops=n_main,
        transcendentals=n_main,
        bytes_accessed=2 * n_main * itemsize,
    )

    scale_arr = s_f32.reshape(1)

    main_out = pl.pallas_call(
        _scale_exp_kernel,
        out_shape=jax.ShapeDtypeStruct((rows, LANES), kdtype),
        grid_spec=pltpu.PrefetchScalarGridSpec(
            num_scalar_prefetch=1,  # scale lands in SMEM
            grid=grid,
            in_specs=[
                pl.BlockSpec((block_rows, LANES), lambda i, scale_ref: (i, 0)),
            ],
            out_specs=pl.BlockSpec((block_rows, LANES), lambda i, scale_ref: (i, 0)),
        ),
        compiler_params=pltpu.CompilerParams(
            dimension_semantics=("parallel",),
            vmem_limit_bytes=vmem_limit,
        ),
        cost_estimate=cost,
    )(scale_arr, x2d)

    out_flat = main_out.reshape(-1)
    if n_main != n:
        # <=127-element ragged tail handled in plain jnp (tiny, fuses fine).
        # TODO(synk): the concatenate re-copies the main output; an in-kernel
        # masked tail (scalar-prefetched valid length) would avoid this pass.
        tail = flat[n_main:]
        tail_out = jnp.exp(tail.astype(jnp.float32) * s_f32).astype(kdtype)
        out_flat = jnp.concatenate([out_flat, tail_out])

    out = out_flat.reshape(orig_shape)
    if out.dtype != out_dtype:
        out = out.astype(out_dtype)
    return out


if __name__ == "__main__":
    key = jax.random.PRNGKey(0)

    # Small NCHW-like input consistent with how the head uses this module.
    x = jax.random.normal(key, (2, 4, 16, 16), dtype=jnp.float32)
    scale = jnp.float32(1.0)  # nn.Parameter(torch.FloatTensor([1.0]))
    ref = jnp.exp(x * scale)

    # Default path (small input -> fused jnp fast path).
    out = jax.block_until_ready(scale_exp(x, scale))
    assert out.shape == x.shape and out.dtype == x.dtype
    assert jnp.allclose(out, ref, atol=1e-5, rtol=1e-5)

    # Force the Pallas kernel on the same small input.
    out_k = jax.block_until_ready(scale_exp(x, scale, min_pallas_elements=0))
    assert out_k.shape == x.shape and out_k.dtype == x.dtype
    assert jnp.allclose(out_k, ref, atol=1e-5, rtol=1e-5)

    # Ragged element count: 128-aligned prefix via kernel + jnp tail; scale != 1.
    k1, k2 = jax.random.split(jax.random.PRNGKey(1))
    x2 = jax.random.normal(k1, (3, 5, 7, 11), dtype=jnp.float32)
    scale2 = jnp.float32(0.5)
    out2 = jax.block_until_ready(scale_exp(x2, scale2, min_pallas_elements=0))
    ref2 = jnp.exp(x2 * scale2)
    assert out2.shape == x2.shape
    assert jnp.allclose(out2, ref2, atol=1e-5, rtol=1e-5)

    # Masked boundary block: rows=17 not a multiple of block_rows.
    x3 = jax.random.normal(k2, (1, 17, 128), dtype=jnp.float32)
    scale3 = jnp.float32(1.3)
    out3 = jax.block_until_ready(scale_exp(x3, scale3, min_pallas_elements=0))
    ref3 = jnp.exp(x3 * scale3)
    assert jnp.allclose(out3, ref3, atol=1e-5, rtol=1e-5)

    # Larger bf16 input: default threshold routes it through the kernel,
    # multi-step grid, native bf16 HBM traffic.
    x4 = jax.random.normal(jax.random.PRNGKey(2), (2, 4, 100, 128),
                           dtype=jnp.bfloat16)
    scale4 = jnp.float32(0.7)
    out4 = jax.block_until_ready(scale_exp(x4, scale4))
    ref4 = jnp.exp(x4.astype(jnp.float32) * scale4).astype(jnp.bfloat16)
    assert out4.dtype == jnp.bfloat16 and out4.shape == x4.shape
    assert jnp.allclose(out4.astype(jnp.float32), ref4.astype(jnp.float32),
                        atol=1e-2, rtol=1e-2)

    print("KERNEL_OK")
</pallas_src>

<mosaic_0001>
module attributes {stable_mosaic.version = 11 : i64} {
  func.func @_scale_exp_kernel(%arg0: i32, %arg1: memref<1xf32, #tpu.memory_space<smem>>, %arg2: memref<8x128xf32, #tpu.memory_space<vmem>>, %arg3: memref<8x128xf32, #tpu.memory_space<vmem>>) attributes {dimension_semantics = [#tpu.dimension_semantics<parallel>], iteration_bounds = array<i64: 2>, scalar_prefetch = 1 : i64, scratch_operands = 0 : i64, tpu.core_type = #tpu.core_type<tc>, window_params = [{transform_indices = @transform_0, window_bounds = array<i64: 8, 128>}, {transform_indices = @transform_1, window_bounds = array<i64: 8, 128>}]} {
    %c0 = arith.constant 0 : index
    %0 = memref.load %arg1[%c0] : memref<1xf32, #tpu.memory_space<smem>>
    %c0_0 = arith.constant 0 : index
    %c0_1 = arith.constant 0 : index
    %1 = vector.load %arg2[%c0_0, %c0_1] : memref<8x128xf32, #tpu.memory_space<vmem>>, vector<8x128xf32>
    %2 = vector.broadcast %0 : f32 to vector<8x128xf32>
    %3 = arith.mulf %1, %2 : vector<8x128xf32>
    %4 = math.exp %3 : vector<8x128xf32>
    %c0_2 = arith.constant 0 : index
    %c0_3 = arith.constant 0 : index
    %5 = vector.load %arg3[%c0_2, %c0_3] : memref<8x128xf32, #tpu.memory_space<vmem>>, vector<8x128xf32>
    tpu.vector_store %arg3[%c0_2, %c0_3], %4 {strides = array<i32>} : memref<8x128xf32, #tpu.memory_space<vmem>>, vector<8x128xf32>,
    return
  }
  func.func @transform_0(%arg0: i32, %arg1: memref<1xf32, #tpu.memory_space<smem>>) -> (i32, i32) {
    %c0_i32 = arith.constant 0 : i32
    %c0_i32_0 = arith.constant 0 : i32
    return %arg0, %c0_i32 : i32, i32
  }
  func.func @transform_1(%arg0: i32, %arg1: memref<1xf32, #tpu.memory_space<smem>>) -> (i32, i32) {
    %c0_i32 = arith.constant 0 : i32
    %c0_i32_0 = arith.constant 0 : i32
    return %arg0, %c0_i32 : i32, i32
  }
}

</mosaic_0001>

<bundles_post_ra>
// kernel: tpu_custom_call.1
= control target key start
LH: loop header
LB: loop body
LE: loop exit
PB: predicated region body
PF: predicated region fallthrough
CT: control target
= control target key end

     0   :  { %s546_s0 = inlined_call_operand.<no memory space> [shape: f32[1], index: 0, kind: input, shape index: {}]   ;;  %s547_s1 = inlined_call_operand.hbm [shape: f32[16,128], index: 1, kind: input, shape index: {}]   ;;  %s548_s2 = inlined_call_operand.hbm [shape: f32[16,128], index: 2, kind: output, shape index: {}]  }
   0x1   :  { %7 = sst [smem:[#allocation3]] %s546_s0 }
   0x2   :  { %8 = vsyncpa [#allocation5], 0 }
   0x3   :  { %10 = vsyncpa [#allocation5 + $0x1], 0 }
   0x4   :  { %11 = vsyncpa [#allocation6], 0 }
   0x5   :  { %13 = vsyncpa [#allocation6 + $0x1], 0  ;;  %s399_s11 = smov 0   ;;  %s401_s12 = smov 0  }
   0x6   :  { %s403_s13 = smov 0   ;;  %s405_s14 = smov 0  }
   0x7 LB: > { %s420_s0 = sadd.s32 4294967295, %s377_s14   ;;  %s225_s15 = sadd.s32 4294967294, %s377_s14   ;;  %s377_s14 = sphi %s405_s14, %s565_s14   ;;  %s373_s13 = sphi %s403_s13, %s564_s13   ;;  %s369_s12 = sphi %s401_s12, %s563_s12   ;;  %s365_s11 = sphi %s399_s11, %s562_s11  }
   0x8   : > { %s424_s16 = sadd.s32 1, %s377_s14   ;;  %s26_s17 = sadd.s32 1, %s373_s13 }
   0x9   : > { %s23_s18 = ssub.s32 %s377_s14, %s424_s16  ;;  %p33_p0 = scmp.ne.s32.totalorder %s373_s13, %s369_s12 }
   0xa   : > { %p24_p1 = scmp.eq.s32.totalorder %s23_s18, 0  ;;  %p34_p2 = scmp.eq.s32.totalorder %s377_s14, 0 }
   0xb   : > { %p39_p3 = scmp.ne.s32.totalorder %s369_s12, %s365_s11  ;;  %p40_p4 = scmp.eq.s32.totalorder %s420_s0, 0 }
   0xc   : > { %s436_s19 = scalar_select %p24_p1, %s373_s13, %s26_s17  }
   0xd   : > { %p438_p5 = por %p34_p2, %p33_p0  ;;  %p442_p6 = por %p40_p4, %p39_p3 }
   0xe   : > { %p63_p7 = scmp.eq.s32.totalorder %s420_s0, 1  ;;  %p69_p8 = scmp.eq.s32.totalorder %s225_s15, 1 }
   0xf   : > { %s552_s21 = scalar_select %p442_p6, 1, 0 }
  0x10   : > { %p249_p10 = scmp.lt.s32.totalorder %s377_s14, 2  ;;  %p449_p11 = por %p63_p7, %p33_p0 }
  0x11   : > { %p453_p12 = por %p69_p8, %p39_p3  ;;  %s89_s24 = sand.u32 1, %s373_s13  }
  0x12   : > { %s553_s22 = scalar_select %p449_p11, 1, 0 }
  0x13   : > { %s554_s23 = scalar_select %p453_p12, 1, 0 }
  0x14   : > { %s229_s25 = sshll.u32 %s377_s14, 7  ;;  %s228_s26 = sshll.u32 %s89_s24, 3 }
  0x15   : > { %s462_s29 = scalar_lea.hbm %s547_s1, %s229_s25  ;;  %s93_s30 = scalar_lea.vmem [#allocation4], %s228_s26 }
  0x16   : > { %s100_s3 = sshll.u32 %s93_s30, 4  ;;  %p466_p13 = pnand %p249_p10, %p438_p5  ;;  %s470_s3 = int_to_ptr.vmem [resolvable:$true] %s100_s3 }
  0x17   : > { %s90_s5 = scalar_lea.sflag [#allocation5], %s89_s24  ;;  %s285_s6 = scalar_lea.hbm %s462_s29, 128 }
  0x18   : > { %p286_p2 = scmp.ne.s32.totalorder %s462_s29, %s285_s6  ;;  %p287_p3 = pneg %p466_p13 }
  0x19   : > { %s290_s9 = scalar_lea.hbm %s547_s1, 256  ;;  %p291_p5 = scmp.lt.s32.totalorder %s462_s29, %s547_s1 }
  0x1a   : > { %p288_p4 = pnand %p287_p3, %p286_p2  ;;  %p292_p8 = scmp.lt.s32.totalorder %s290_s9, %s285_s6 }
  0x1c   : > { %p289_p7 = pneg %p288_p4  ;;  %p293_p10 = por %p292_p8, %p291_p5 }
  0x1e   : > { %p294_p9 = pnand %p293_p10, %p289_p7 }
  0x20   : > { %297 = shalt.err (!%p294_p9)
}
  0x21   : > { %s298_s17 = scalar_lea.vmem %s470_s3, 128  ;;  %s379_s18 = smov [#allocation4]  }
  0x22   : > { %p299_p0 = scmp.ne.s32.totalorder %s470_s3, %s298_s17  ;;  %s303_s20 = sshll.u32 %s379_s18, 4  ;;  %s304_s20 = int_to_ptr.vmem [resolvable:$false] %s303_s20 }
  0x23   : > { %s305_s24 = scalar_lea.vmem %s304_s20, 256  ;;  %p306_p4 = scmp.lt.s32.totalorder %s470_s3, %s304_s20 }
  0x24   : > { %p301_p1 = pnand %p299_p0, %p287_p3  ;;  %p307_p12 = scmp.lt.s32.totalorder %s305_s24, %s298_s17 }
  0x26   : > { %p302_p2 = pneg %p301_p1  ;;  %p308_p11 = por %p307_p12, %p306_p4 }
  0x28   : > { %p309_p6 = pnand %p308_p11, %p302_p2 }
  0x2a   : > { %312 = shalt.err (!%p309_p6)
}
  0x2b   : > { %244 = dma.hbm_to_vmem [thread:$0]  (!%p466_p13), %s462_s29, 128, %s470_s3, %s90_s5  }
  0x2c   : > { %p556_p9 = scmp.lt.s32.totalorder %s377_s14, 3  ;;  %p557_p7 = scmp.ge.s32.totalorder %s377_s14, 1 }
  0x2e   : > { %p106_p0 = pnand %p557_p7, %p556_p9 }
  0x2f   : > { %s497_s25 = sand.u32 (!%p106_p0), 1, %s369_s12   ;;  %p558_p6 = scmp.ne.s32.totalorder (!%p106_p0), %s552_s21, 0 }
  0x30   : > { %109 = sbr.rel (%p106_p0) target bundleno = 92 (0x5c), region = 24  ;;  %s231_s26 = sshll.u32 (!%p106_p0), %s497_s25, 3 }
  0x31   : > { %s112_s27 = scalar_lea.sflag (!%p106_p0), [#allocation5], %s497_s25  ;;  %s115_s28 = scalar_lea.vmem (!%p106_p0), [#allocation4], %s231_s26 }
  0x35   : > { %356 = dma.done.wait (%p558_p6), %s112_s27, 128  }
  0x36   : > { %358 = vsyncadd (%p558_p6), %s112_s27, 4294967168  ;;  %s134_s29 = sld [smem:[#allocation3]]  ;;  %v135_v0 = vld [vmem:[%s115_s28] sm:$0xff]  ;;  %s133_s30 = scalar_lea.vmem [#allocation7], %s231_s26 }
  0x37   : > { %s155_s3 = sshll.u32 %s133_s30, 4  ;;  %s234_s4 = sshll.u32 %s420_s0, 7  ;;  %s506_s3 = int_to_ptr.vmem [resolvable:$true] %s155_s3 }
  0x38   : > { %s153_s21 = scalar_lea.hbm %s548_s2, %s234_s4  ;;  %s142_s7 = scalar_lea.sflag [#allocation6], %s497_s25 }
  0x39   : > { %s313_s8 = scalar_lea.vmem %s506_s3, 128  ;;  %p559_p12 = scmp.ne.s32.totalorder %s553_s22, 0 }
  0x3a   : > { %p314_p11 = scmp.ne.s32.totalorder %s506_s3, %s313_s8  ;;  %s380_s9 = smov [#allocation7]  }
  0x3b   : > { %s317_s10 = sshll.u32 %s380_s9, 4  ;;  %s318_s10 = int_to_ptr.vmem [resolvable:$false] %s317_s10 }
  0x3c   : > { %v136_v1 = vstv %s134_s29  ;;  %p315_p13 = pnand %p314_p11, %p559_p12  ;;  %s319_s0 = scalar_lea.vmem %s318_s10, 256 }
  0x3d   : > { %v137_v2 = vmul.f32 %v136_v1, %v135_v0  ;;  %p320_p3 = scmp.lt.s32.totalorder %s506_s3, %s318_s10  ;;  %p321_p5 = scmp.lt.s32.totalorder %s319_s0, %s313_s8 }
  0x3e   : > { %p316_p1 = pneg %p315_p13 }
  0x3f   : > { %v138_v3 = vmul.f32 1.442695, %v137_v2  ;;  %p322_p8 = por %p321_p5, %p320_p3 }
  0x41   : > { %283 = vpow2.f32 %v138_v3  ;;  %p323_p10 = pnand %p322_p8, %p316_p1 }
  0x4e   : > { %v284_v4 = vpop.eup %283 }
  0x4f   : > { %140 = vst [vmem:[%s133_s30] sm:$0xff] %v284_v4 }
  0x50   : > { %326 = shalt.err (!%p323_p10)
}
  0x51   : > { %s327_s15 = scalar_lea.hbm %s153_s21, 128  ;;  %s331_s20 = scalar_lea.hbm %s548_s2, 256 }
  0x52   : > { %p328_p2 = scmp.ne.s32.totalorder %s153_s21, %s327_s15  ;;  %p332_p7 = scmp.lt.s32.totalorder %s153_s21, %s548_s2 }
  0x53   : > { %p333_p0 = scmp.lt.s32.totalorder %s331_s20, %s327_s15 }
  0x54   : > { %p329_p4 = pnand %p328_p2, %p559_p12 }
  0x55   : > { %p334_p6 = por %p333_p0, %p332_p7 }
  0x56   : > { %p330_p9 = pneg %p329_p4 }
  0x58   : > { %p335_p11 = pnand %p334_p6, %p330_p9 }
  0x5a   : > { %338 = shalt.err (!%p335_p11)
}
  0x5b   : > { %239 = dma.vmem_to_hbm [thread:$0]  (%p559_p12), %s506_s3, 128, %s153_s21, %s142_s7  }
  0x5c PF: > { %s167_s26 = sand.u32 1, %s365_s11   ;;  %p560_p13 = scmp.ne.s32.totalorder %s554_s23, 0 }
  0x5d   : > { %p561_p1 = scmp.ge.s32.totalorder %s377_s14, 2  ;;  %s168_s27 = scalar_lea.sflag [#allocation6], %s167_s26 }
  0x5f   : > { %p246_p3 = pnand %p561_p1, %p560_p13 }
  0x61   : > { %p247_p5 = pneg %p246_p3 }
  0x63   : > { %360 = dma.done.wait (%p247_p5), %s168_s27, 128  }
  0x64   : > { %362 = vsyncadd (%p247_p5), %s168_s27, 4294967168  ;;  %p16_p8 = scmp.ge.s32.totalorder %s424_s16, 4   ;;  %s562_s11 = smov %s369_s12 }
  0x65   : > { %s563_s12 = smov %s373_s13  ;;  %s564_s13 = smov %s436_s19 }
  0x66   : > { %s565_s14 = smov %s424_s16  ;;  %18 = sbr.rel (!%p16_p8) target bundleno = 7 (0x7), region = 69 }
  0x6b   :  { %173 = vsyncpa [#allocation5], 1 }
  0x6c   :  { %175 = vsyncpa [#allocation5 + $0x1], 1 }
  0x6d   :  { %176 = vsyncpa [#allocation6], 1 }
  0x6e   :  { %178 = vsyncpa [#allocation6 + $0x1], 1 }

</bundles_post_ra>
